<compile_context>
chip_gen: v7x
topology: tpu7x:2x2x1
jax: 0.10.0
libtpu: 0.0.40
codegen_flags: <defaults>
</compile_context>

<pallas_src>
import functools

import jax
import jax.numpy as jnp
from jax.experimental import pallas as pl
from jax.experimental.pallas import tpu as pltpu

BN_EPS = 1e-5
BIG_TILE = 1024       # rows per grid step for large N (86% of HBM roofline on v6e)
MIN_TILE = 256        # lower bound when splitting for v7x 2-TC sharding
LANE = 128


def _round_up(x, m):
    return ((x + m - 1) // m) * m


# ---------------------------------------------------------------------------
# Kernel: three BN-folded linears with ReLU between them.
# Dropout(p=0.5) is identity in eval mode.
# ---------------------------------------------------------------------------
def cls_head_kernel(feat_ref, w1_ref, b1_ref, w2_ref, b2_ref, w3_ref, b3_ref,
                    out_ref):
    # In-kernel f32 -> bf16 cast (VPU slack); avoids a separate wrapper-side HBM pass.
    x = feat_ref[...].astype(jnp.bfloat16)                              # [tm, C]

    # Linear(embed_dim -> 256) with BN folded in, f32 accumulation on the MXU.
    h = jnp.dot(x, w1_ref[...], preferred_element_type=jnp.float32) + b1_ref[...]
    h = jnp.maximum(h, 0.0).astype(jnp.bfloat16)      # ReLU; Dropout = identity (eval)

    # Linear(256 -> 128) with BN folded in.
    h = jnp.dot(h, w2_ref[...], preferred_element_type=jnp.float32) + b2_ref[...]
    h = jnp.maximum(h, 0.0).astype(jnp.bfloat16)      # ReLU; Dropout = identity (eval)

    # Linear(128 -> num_classes), output padded to a lane-dense 128-wide block,
    # written back in bf16 to halve the padded-output HBM traffic.
    out = jnp.dot(h, w3_ref[...], preferred_element_type=jnp.float32) + b3_ref[...]
    out_ref[...] = out.astype(out_ref.dtype)


# ---------------------------------------------------------------------------
# One-time (model-load) parameter preparation: transpose, BN fold, pad, cast.
# ---------------------------------------------------------------------------
def fold_params(p):
    """PyTorch-layout params -> kernel-layout folded params. Call once at load time."""
    def fold(w, b, g, be, m, v):
        s = g / jnp.sqrt(v + BN_EPS)                  # [out]
        w_f = w.T.astype(jnp.float32) * s[None, :]    # [in, out]
        b_f = b * s + (be - m * s)                    # [out]
        return w_f, b_f

    w1, b1 = fold(p["w1"], p["b1"], p["g1"], p["be1"], p["m1"], p["v1"])
    w2, b2 = fold(p["w2"], p["b2"], p["g2"], p["be2"], p["m2"], p["v2"])

    num_classes = p["w3"].shape[0]
    out_pad = _round_up(num_classes, LANE)            # lane-dense output width
    w3 = jnp.pad(p["w3"].T.astype(jnp.float32), ((0, 0), (0, out_pad - num_classes)))
    b3 = jnp.pad(p["b3"].astype(jnp.float32), ((0, out_pad - num_classes),))

    folded = {
        "w1": w1.astype(jnp.bfloat16), "b1": b1.reshape(1, -1).astype(jnp.float32),
        "w2": w2.astype(jnp.bfloat16), "b2": b2.reshape(1, -1).astype(jnp.float32),
        "w3": w3.astype(jnp.bfloat16), "b3": b3.reshape(1, -1).astype(jnp.float32),
    }
    return folded, num_classes


# ---------------------------------------------------------------------------
# Wrapper: tile the batch dimension, keep weights resident across grid steps.
# No wrapper-side astype/pad passes over feat (both were extra full HBM passes).
# ---------------------------------------------------------------------------
@functools.partial(jax.jit, static_argnames=("num_classes",))
def cls_head_pallas(feat, folded, num_classes):
    """feat: [N, backbone_embed_dim] (f32 or bf16). Returns cls_logits [N, num_classes] f32."""
    N, C = feat.shape
    H1 = folded["w1"].shape[1]
    H2 = folded["w2"].shape[1]
    OUTP = folded["w3"].shape[1]

    if N <= BIG_TILE:
        # Whole problem as a single resident block (full-dim blocks are always legal);
        # avoids pipeline prologue / per-step overhead for the serving-sized case.
        tile_m = N
    else:
        # Large batch: big tiles to amortize the ~0.35 us/step grid overhead, capped so
        # the grid keeps >=4 steps (v7x shards the "parallel" axis across its 2 TCs).
        tile_m = min(BIG_TILE, max(MIN_TILE, _round_up(pl.cdiv(N, 4), 128)))
    grid = (pl.cdiv(N, tile_m),)       # ragged last block; padded rows are discarded
    const = lambda i: (0, 0)           # weights/biases: same block every step (resident)

    out_padded = pl.pallas_call(
        cls_head_kernel,
        out_shape=jax.ShapeDtypeStruct((N, OUTP), jnp.bfloat16),
        grid=grid,
        in_specs=[
            pl.BlockSpec((tile_m, C), lambda i: (i, 0)),   # streamed feat tiles (f32)
            pl.BlockSpec((C, H1), const),
            pl.BlockSpec((1, H1), const),
            pl.BlockSpec((H1, H2), const),
            pl.BlockSpec((1, H2), const),
            pl.BlockSpec((H2, OUTP), const),
            pl.BlockSpec((1, OUTP), const),
        ],
        out_specs=pl.BlockSpec((tile_m, OUTP), lambda i: (i, 0)),
        compiler_params=pltpu.CompilerParams(
            dimension_semantics=("parallel",),             # 2-TC sharding on v7x
        ),
    )(feat, folded["w1"], folded["b1"], folded["w2"], folded["b2"],
      folded["w3"], folded["b3"])

    # Small epilogue: strip lane padding, return f32 logits (module semantics).
    return out_padded[:, :num_classes].astype(jnp.float32)


# ---------------------------------------------------------------------------
# References.
# ---------------------------------------------------------------------------
def cls_head_ref_f32(feat, p):
    """Pure-JAX f32 reference matching PyTorch eval semantics (unfolded BN)."""
    h = feat @ p["w1"].T + p["b1"]
    h = (h - p["m1"]) * p["g1"] / jnp.sqrt(p["v1"] + BN_EPS) + p["be1"]
    h = jnp.maximum(h, 0.0)
    h = h @ p["w2"].T + p["b2"]
    h = (h - p["m2"]) * p["g2"] / jnp.sqrt(p["v2"] + BN_EPS) + p["be2"]
    h = jnp.maximum(h, 0.0)
    return h @ p["w3"].T + p["b3"]


def cls_head_ref_bf16(feat, folded, num_classes):
    """Reference with the same bf16-in / f32-accumulate / bf16-out numerics as the kernel."""
    x = feat.astype(jnp.bfloat16)
    h = jnp.dot(x, folded["w1"], preferred_element_type=jnp.float32) + folded["b1"]
    h = jnp.maximum(h, 0.0).astype(jnp.bfloat16)
    h = jnp.dot(h, folded["w2"], preferred_element_type=jnp.float32) + folded["b2"]
    h = jnp.maximum(h, 0.0).astype(jnp.bfloat16)
    out = jnp.dot(h, folded["w3"], preferred_element_type=jnp.float32) + folded["b3"]
    return out.astype(jnp.bfloat16)[:, :num_classes].astype(jnp.float32)


def init_params(key, embed_dim=256, num_classes=40):
    ks = jax.random.split(key, 8)
    scale = 0.05
    p = {
        # PyTorch nn.Linear layout: [out_features, in_features]
        "w1": scale * jax.random.normal(ks[0], (256, embed_dim), jnp.float32),
        "b1": scale * jax.random.normal(ks[1], (256,), jnp.float32),
        "g1": 1.0 + 0.1 * jax.random.normal(ks[2], (256,), jnp.float32),
        "be1": 0.1 * jax.random.normal(ks[3], (256,), jnp.float32),
        "m1": 0.05 * jax.random.normal(ks[4], (256,), jnp.float32),
        "v1": 1.0 + 0.1 * jnp.abs(jax.random.normal(ks[5], (256,), jnp.float32)),
        "w2": scale * jax.random.normal(ks[6], (128, 256), jnp.float32),
        "b2": scale * jax.random.normal(ks[7], (128,), jnp.float32),
    }
    ks2 = jax.random.split(ks[7], 8)
    p.update({
        "g2": 1.0 + 0.1 * jax.random.normal(ks2[0], (128,), jnp.float32),
        "be2": 0.1 * jax.random.normal(ks2[1], (128,), jnp.float32),
        "m2": 0.05 * jax.random.normal(ks2[2], (128,), jnp.float32),
        "v2": 1.0 + 0.1 * jnp.abs(jax.random.normal(ks2[3], (128,), jnp.float32)),
        "w3": scale * jax.random.normal(ks2[4], (num_classes, 128), jnp.float32),
        "b3": scale * jax.random.normal(ks2[5], (num_classes,), jnp.float32),
    })
    return p


if __name__ == "__main__":
    # TODO(synk): backbone is built from an external config (build_model) and criteria
    # (loss) branch requires 'category'; here feat is the synthetic backbone output and
    # only the inference cls_logits path is implemented as a kernel.
    key = jax.random.PRNGKey(0)
    k_feat, k_par, k_feat2 = jax.random.split(key, 3)

    EMBED_DIM = 256             # backbone_embed_dim (module default)
    NUM_CLASSES = 40

    params = init_params(k_par, EMBED_DIM, NUM_CLASSES)
    # One-time model-load preparation (BN fold, transpose, pad, cast).
    folded, num_classes = fold_params(params)
    folded = jax.tree_util.tree_map(jax.block_until_ready, folded)

    # --- Test 1: small batch (single resident block, no grid pipelining). ---
    N = 16
    feat = jax.random.normal(k_feat, (N, EMBED_DIM), jnp.float32)

    cls_logits = cls_head_pallas(feat, folded, num_classes)
    cls_logits = jax.block_until_ready(cls_logits)
    assert cls_logits.shape == (N, NUM_CLASSES)

    ref_bf16 = cls_head_ref_bf16(feat, folded, num_classes)
    assert jnp.allclose(cls_logits, ref_bf16, atol=2e-2, rtol=2e-2), (
        float(jnp.max(jnp.abs(cls_logits - ref_bf16))))

    ref_f32 = cls_head_ref_f32(feat, params)
    assert jnp.allclose(cls_logits, ref_f32, atol=6e-2, rtol=6e-2), (
        float(jnp.max(jnp.abs(cls_logits - ref_f32))))

    # --- Test 2: larger batch exercising the tiled grid with a ragged last block. ---
    N2 = 2500
    feat2 = jax.random.normal(k_feat2, (N2, EMBED_DIM), jnp.float32)

    cls_logits2 = cls_head_pallas(feat2, folded, num_classes)
    cls_logits2 = jax.block_until_ready(cls_logits2)
    assert cls_logits2.shape == (N2, NUM_CLASSES)

    ref2_bf16 = cls_head_ref_bf16(feat2, folded, num_classes)
    assert jnp.allclose(cls_logits2, ref2_bf16, atol=2e-2, rtol=2e-2), (
        float(jnp.max(jnp.abs(cls_logits2 - ref2_bf16))))

    ref2_f32 = cls_head_ref_f32(feat2, params)
    assert jnp.allclose(cls_logits2, ref2_f32, atol=6e-2, rtol=6e-2), (
        float(jnp.max(jnp.abs(cls_logits2 - ref2_f32))))

    print("KERNEL_OK")
</pallas_src>

<mosaic_0001>
module attributes {stable_mosaic.version = 11 : i64} {
  func.func @cls_head_kernel(%arg0: i32, %arg1: memref<16x256xf32, #tpu.memory_space<vmem>>, %arg2: memref<256x256xbf16, #tpu.memory_space<vmem>>, %arg3: memref<1x256xf32, #tpu.memory_space<vmem>>, %arg4: memref<256x128xbf16, #tpu.memory_space<vmem>>, %arg5: memref<1x128xf32, #tpu.memory_space<vmem>>, %arg6: memref<128x128xbf16, #tpu.memory_space<vmem>>, %arg7: memref<1x128xf32, #tpu.memory_space<vmem>>, %arg8: memref<16x128xbf16, #tpu.memory_space<vmem>>) attributes {dimension_semantics = [#tpu.dimension_semantics<parallel>], iteration_bounds = array<i64: 1>, scalar_prefetch = 0 : i64, scratch_operands = 0 : i64, tpu.core_type = #tpu.core_type<tc>, window_params = [{transform_indices = @transform_0, window_bounds = array<i64: 16, 256>}, {pipeline_mode = #tpu.pipeline_mode<synchronous>, transform_indices = @transform_1, window_bounds = array<i64: 256, 256>}, {pipeline_mode = #tpu.pipeline_mode<synchronous>, transform_indices = @transform_2, window_bounds = array<i64: 1, 256>}, {pipeline_mode = #tpu.pipeline_mode<synchronous>, transform_indices = @transform_3, window_bounds = array<i64: 256, 128>}, {pipeline_mode = #tpu.pipeline_mode<synchronous>, transform_indices = @transform_4, window_bounds = array<i64: 1, 128>}, {pipeline_mode = #tpu.pipeline_mode<synchronous>, transform_indices = @transform_5, window_bounds = array<i64: 128, 128>}, {pipeline_mode = #tpu.pipeline_mode<synchronous>, transform_indices = @transform_6, window_bounds = array<i64: 1, 128>}, {transform_indices = @transform_7, window_bounds = array<i64: 16, 128>}]} {
    %c0 = arith.constant 0 : index
    %c0_0 = arith.constant 0 : index
    %0 = vector.load %arg1[%c0, %c0_0] : memref<16x256xf32, #tpu.memory_space<vmem>>, vector<16x256xf32>
    %1 = arith.truncf %0 : vector<16x256xf32> to vector<16x256xbf16>
    %c0_1 = arith.constant 0 : index
    %c0_2 = arith.constant 0 : index
    %2 = vector.load %arg2[%c0_1, %c0_2] : memref<256x256xbf16, #tpu.memory_space<vmem>>, vector<256x256xbf16>
    %cst = arith.constant dense<0.000000e+00> : vector<16x256xf32>
    %3 = tpu.matmul %1, %2, %cst {dimension_numbers = #tpu.dot_dimension_numbers<[1], [0], [0], [1], [0, 0, 1, 1], [], []>} : vector<16x256xbf16>, vector<256x256xbf16>, vector<16x256xf32> -> vector<16x256xf32>
    %c0_3 = arith.constant 0 : index
    %c0_4 = arith.constant 0 : index
    %4 = vector.load %arg3[%c0_3, %c0_4] : memref<1x256xf32, #tpu.memory_space<vmem>>, vector<1x256xf32>
    %5 = vector.broadcast %4 : vector<1x256xf32> to vector<16x256xf32>
    %6 = arith.addf %3, %5 : vector<16x256xf32>
    %cst_5 = arith.constant 0.000000e+00 : f32
    %7 = vector.broadcast %cst_5 : f32 to vector<16x256xf32>
    %8 = arith.maximumf %6, %7 : vector<16x256xf32>
    %9 = arith.truncf %8 : vector<16x256xf32> to vector<16x256xbf16>
    %c0_6 = arith.constant 0 : index
    %c0_7 = arith.constant 0 : index
    %10 = vector.load %arg4[%c0_6, %c0_7] : memref<256x128xbf16, #tpu.memory_space<vmem>>, vector<256x128xbf16>
    %cst_8 = arith.constant dense<0.000000e+00> : vector<16x128xf32>
    %11 = tpu.matmul %9, %10, %cst_8 {dimension_numbers = #tpu.dot_dimension_numbers<[1], [0], [0], [1], [0, 0, 1, 1], [], []>} : vector<16x256xbf16>, vector<256x128xbf16>, vector<16x128xf32> -> vector<16x128xf32>
    %c0_9 = arith.constant 0 : index
    %c0_10 = arith.constant 0 : index
    %12 = vector.load %arg5[%c0_9, %c0_10] : memref<1x128xf32, #tpu.memory_space<vmem>>, vector<1x128xf32>
    %13 = vector.broadcast %12 : vector<1x128xf32> to vector<16x128xf32>
    %14 = arith.addf %11, %13 : vector<16x128xf32>
    %cst_11 = arith.constant 0.000000e+00 : f32
    %15 = vector.broadcast %cst_11 : f32 to vector<16x128xf32>
    %16 = arith.maximumf %14, %15 : vector<16x128xf32>
    %17 = arith.truncf %16 : vector<16x128xf32> to vector<16x128xbf16>
    %c0_12 = arith.constant 0 : index
    %c0_13 = arith.constant 0 : index
    %18 = vector.load %arg6[%c0_12, %c0_13] : memref<128x128xbf16, #tpu.memory_space<vmem>>, vector<128x128xbf16>
    %cst_14 = arith.constant dense<0.000000e+00> : vector<16x128xf32>
    %19 = tpu.matmul %17, %18, %cst_14 {dimension_numbers = #tpu.dot_dimension_numbers<[1], [0], [0], [1], [0, 0, 1, 1], [], []>} : vector<16x128xbf16>, vector<128x128xbf16>, vector<16x128xf32> -> vector<16x128xf32>
    %c0_15 = arith.constant 0 : index
    %c0_16 = arith.constant 0 : index
    %20 = vector.load %arg7[%c0_15, %c0_16] : memref<1x128xf32, #tpu.memory_space<vmem>>, vector<1x128xf32>
    %21 = vector.broadcast %20 : vector<1x128xf32> to vector<16x128xf32>
    %22 = arith.addf %19, %21 : vector<16x128xf32>
    %23 = arith.truncf %22 : vector<16x128xf32> to vector<16x128xbf16>
    %c0_17 = arith.constant 0 : index
    %c0_18 = arith.constant 0 : index
    %24 = vector.load %arg8[%c0_17, %c0_18] : memref<16x128xbf16, #tpu.memory_space<vmem>>, vector<16x128xbf16>
    tpu.vector_store %arg8[%c0_17, %c0_18], %23 {strides = array<i32>} : memref<16x128xbf16, #tpu.memory_space<vmem>>, vector<16x128xbf16>,
    return
  }
  func.func @transform_0(%arg0: i32) -> (i32, i32) {
    %c0_i32 = arith.constant 0 : i32
    %c0_i32_0 = arith.constant 0 : i32
    return %arg0, %c0_i32 : i32, i32
  }
  func.func @transform_1(%arg0: i32) -> (i32, i32) {
    %c0_i32 = arith.constant 0 : i32
    %c0_i32_0 = arith.constant 0 : i32
    %c0_i32_1 = arith.constant 0 : i32
    return %c0_i32, %c0_i32_0 : i32, i32
  }
  func.func @transform_2(%arg0: i32) -> (i32, i32) {
    %c0_i32 = arith.constant 0 : i32
    %c0_i32_0 = arith.constant 0 : i32
    %c0_i32_1 = arith.constant 0 : i32
    return %c0_i32, %c0_i32_0 : i32, i32
  }
  func.func @transform_3(%arg0: i32) -> (i32, i32) {
    %c0_i32 = arith.constant 0 : i32
    %c0_i32_0 = arith.constant 0 : i32
    %c0_i32_1 = arith.constant 0 : i32
    return %c0_i32, %c0_i32_0 : i32, i32
  }
  func.func @transform_4(%arg0: i32) -> (i32, i32) {
    %c0_i32 = arith.constant 0 : i32
    %c0_i32_0 = arith.constant 0 : i32
    %c0_i32_1 = arith.constant 0 : i32
    return %c0_i32, %c0_i32_0 : i32, i32
  }
  func.func @transform_5(%arg0: i32) -> (i32, i32) {
    %c0_i32 = arith.constant 0 : i32
    %c0_i32_0 = arith.constant 0 : i32
    %c0_i32_1 = arith.constant 0 : i32
    return %c0_i32, %c0_i32_0 : i32, i32
  }
  func.func @transform_6(%arg0: i32) -> (i32, i32) {
    %c0_i32 = arith.constant 0 : i32
    %c0_i32_0 = arith.constant 0 : i32
    %c0_i32_1 = arith.constant 0 : i32
    return %c0_i32, %c0_i32_0 : i32, i32
  }
  func.func @transform_7(%arg0: i32) -> (i32, i32) {
    %c0_i32 = arith.constant 0 : i32
    %c0_i32_0 = arith.constant 0 : i32
    return %arg0, %c0_i32 : i32, i32
  }
}

</mosaic_0001>

<bundles_post_ra>
// kernel: cls_head_pallas.1
= control target key start
LH: loop header
LB: loop body
LE: loop exit
PB: predicated region body
PF: predicated region fallthrough
CT: control target
= control target key end

     0   :  { %12 = vsyncpa [#allocation3], 0  ;;  %s1057_s0 = inlined_call_operand.hbm [shape: f32[16,256], index: 0, kind: input, shape index: {}]   ;;  %s1058_s1 = inlined_call_operand.hbm [shape: bf16[256,256], index: 1, kind: input, shape index: {}]   ;;  %s1059_s2 = inlined_call_operand.vmem [shape: f32[1,256], index: 2, kind: input, shape index: {}]   ;;  %s1060_s3 = inlined_call_operand.hbm [shape: bf16[256,128], index: 3, kind: input, shape index: {}]   ;;  %s1061_s4 = inlined_call_operand.vmem [shape: f32[1,128], index: 4, kind: input, shape index: {}]   ;;  %s1062_s5 = inlined_call_operand.hbm [shape: bf16[128,128], index: 5, kind: input, shape index: {}]   ;;  %s1063_s6 = inlined_call_operand.vmem [shape: f32[1,128], index: 6, kind: input, shape index: {}]   ;;  %s1064_s7 = inlined_call_operand.vmem [shape: bf16[16,128], index: 7, kind: output, shape index: {}]  }
   0x1   :  { %13 = vsyncpa [#allocation5], 0 }
   0x2   :  { %14 = vsyncpa [#allocation8], 0  ;;  %s945_s24 = smov [#allocation4]   ;;  %s851_s28 = scalar_lea.hbm %s1058_s1, 4096 }
   0x3   :  { %s32_s25 = sshll.u32 %s945_s24, 4  ;;  %p852_p0 = scmp.ne.s32.totalorder %s1058_s1, %s851_s28  ;;  %s33_s25 = int_to_ptr.vmem [resolvable:$true] %s32_s25 }
   0x4   :  { %p855_p1 = scmp.lt.u32.totalorder %s851_s28, %s1058_s1 }
   0x6   :  { %p857_p2 = pnand %p855_p1, %p852_p0 }
   0x8   :  { %860 = shalt.err (!%p857_p2)
}
   0x9   :  { %s861_s10 = scalar_lea.vmem %s33_s25, 4096  ;;  %p866_p4 = scmp.lt.s32.totalorder %s33_s25, %s33_s25 }
   0xa   :  { %p862_p3 = scmp.ne.s32.totalorder %s33_s25, %s861_s10  ;;  %p867_p5 = scmp.lt.s32.totalorder %s861_s10, %s861_s10 }
   0xc   :  { %p868_p6 = por %p867_p5, %p866_p4 }
   0xe   :  { %p869_p7 = pnand %p868_p6, %p862_p3 }
  0x10   :  { %872 = shalt.err (!%p869_p7)
}
  0x11   :  { %s946_s11 = smov 128   ;;  %s947_s12 = smov 8  }
  0x12   :  { %38 = dma.hbm_to_vmem [thread:$0]  %s1058_s1, 4096, %s33_s25, [#allocation5], %s946_s11, %s946_s11, %s947_s12  }
  0x13   :  { %s948_s15 = smov [#allocation2]   ;;  %s873_s19 = scalar_lea.hbm %s1057_s0, 512 }
  0x14   :  { %s20_s16 = sshll.u32 %s948_s15, 4  ;;  %p874_p8 = scmp.ne.s32.totalorder %s1057_s0, %s873_s19  ;;  %s21_s16 = int_to_ptr.vmem [resolvable:$true] %s20_s16 }
  0x15   :  { %p877_p9 = scmp.lt.u32.totalorder %s873_s19, %s1057_s0 }
  0x17   :  { %p879_p10 = pnand %p877_p9, %p874_p8 }
  0x19   :  { %882 = shalt.err (!%p879_p10)
}
  0x1a   :  { %s883_s24 = scalar_lea.vmem %s21_s16, 512  ;;  %p888_p12 = scmp.lt.s32.totalorder %s21_s16, %s21_s16 }
  0x1b   :  { %p884_p11 = scmp.ne.s32.totalorder %s21_s16, %s883_s24  ;;  %p889_p13 = scmp.lt.s32.totalorder %s883_s24, %s883_s24 }
  0x1d   :  { %p890_p0 = por %p889_p13, %p888_p12 }
  0x1f   :  { %p891_p1 = pnand %p890_p0, %p884_p11 }
  0x21   :  { %894 = shalt.err (!%p891_p1)
}
  0x22   :  { %s949_s1 = smov 256   ;;  %s950_s25 = smov 16  }
  0x23   :  { %26 = dma.hbm_to_vmem [thread:$0]  %s1057_s0, 512, %s21_s16, [#allocation3], %s949_s1, %s949_s1, %s950_s25  }
  0x24   :  { %s951_s28 = smov [#allocation6]   ;;  %s895_s9 = scalar_lea.hbm %s1060_s3, 2048 }
  0x25   :  { %s46_s29 = sshll.u32 %s951_s28, 4  ;;  %p896_p2 = scmp.ne.s32.totalorder %s1060_s3, %s895_s9  ;;  %s47_s29 = int_to_ptr.vmem [resolvable:$true] %s46_s29 }
  0x26   :  { %p899_p3 = scmp.lt.u32.totalorder %s895_s9, %s1060_s3 }
  0x28   :  { %p901_p4 = pnand %p899_p3, %p896_p2 }
  0x2a   :  { %904 = shalt.err (!%p901_p4)
}
  0x2b   :  { %s905_s14 = scalar_lea.vmem %s47_s29, 2048  ;;  %p910_p6 = scmp.lt.s32.totalorder %s47_s29, %s47_s29 }
  0x2c   :  { %p906_p5 = scmp.ne.s32.totalorder %s47_s29, %s905_s14  ;;  %p911_p7 = scmp.lt.s32.totalorder %s905_s14, %s905_s14 }
  0x2e   :  { %p912_p8 = por %p911_p7, %p910_p6 }
  0x30   :  { %p913_p9 = pnand %p912_p8, %p906_p5 }
  0x32   :  { %916 = shalt.err (!%p913_p9)
}
  0x33   :  { %s952_s0 = smov 64   ;;  %s953_s15 = smov 4  }
  0x34   :  { %52 = dma.hbm_to_vmem [thread:$0]  %s1060_s3, 2048, %s47_s29, [#allocation5], %s952_s0, %s952_s0, %s953_s15  }
  0x35   :  { %s954_s18 = smov [#allocation7]   ;;  %s917_s22 = scalar_lea.hbm %s1062_s5, 1024 }
  0x36   :  { %s60_s19 = sshll.u32 %s954_s18, 4  ;;  %p918_p10 = scmp.ne.s32.totalorder %s1062_s5, %s917_s22  ;;  %s61_s19 = int_to_ptr.vmem [resolvable:$true] %s60_s19 }
  0x37   :  { %p921_p11 = scmp.lt.u32.totalorder %s917_s22, %s1062_s5 }
  0x39   :  { %p923_p12 = pnand %p921_p11, %p918_p10 }
  0x3b   :  { %926 = shalt.err (!%p923_p12)
}
  0x3c   :  { %s927_s26 = scalar_lea.vmem %s61_s19, 1024  ;;  %p932_p0 = scmp.lt.s32.totalorder %s61_s19, %s61_s19 }
  0x3d   :  { %p928_p13 = scmp.ne.s32.totalorder %s61_s19, %s927_s26  ;;  %p933_p1 = scmp.lt.s32.totalorder %s927_s26, %s927_s26 }
  0x3f   :  { %p934_p2 = por %p933_p1, %p932_p0 }
  0x41   :  { %p935_p3 = pnand %p934_p2, %p928_p13 }
  0x43   :  { %938 = shalt.err (!%p935_p3)
}
  0x44   :  { %66 = dma.hbm_to_vmem [thread:$0]  %s1062_s5, 1024, %s61_s19, [#allocation8], %s952_s0, %s952_s0, %s953_s15  }
  0x45   :  { %939 = dma.done.wait [#allocation3], 512  }
  0x46   :  { %940 = vsyncadd [#allocation3], 4294966784 }
  0x47   :  { %941 = dma.done.wait [#allocation5], 6144  }
  0x48   :  { %942 = vsyncadd [#allocation5], 4294961152 }
  0x49   :  { %943 = dma.done.wait [#allocation8], 1024  }
  0x4a   :  { %944 = vsyncadd [#allocation8], 4294966272  ;;  %v779_v0 = vld [vmem:[#allocation4 + $0x4] ss:$8 sps:$4 sm:$0xff]   ;;  %v781_v1 = vld [vmem:[#allocation4] ss:$8 sps:$4 sm:$0xff]   ;;  %v122_v55 = vlaneseq }
  0x4b   :  { %292 = vmatprep.subr.bf16.mxu0 %v779_v0  ;;  %v782_v2 = vld [vmem:[#allocation4 + $0x14] ss:$8 sps:$4 sm:$0xff]   ;;  %v784_v3 = vld [vmem:[#allocation4 + $0x10] ss:$8 sps:$4 sm:$0xff]   ;;  %v785_v4 = vld [vmem:[#allocation4 + $0x24] ss:$8 sps:$4 sm:$0xff]  }
  0x4c   :  { %293 = vmatpush1.bf16.msra.mxu0 %v781_v1  ;;  %v787_v5 = vld [vmem:[#allocation4 + $0x20] ss:$8 sps:$4 sm:$0xff]   ;;  %v788_v6 = vld [vmem:[#allocation4 + $0x34] ss:$8 sps:$4 sm:$0xff]   ;;  %v790_v7 = vld [vmem:[#allocation4 + $0x30] ss:$8 sps:$4 sm:$0xff]  }
  0x4d   :  { %294 = vmatprep.subr.bf16.mxu0 %v782_v2  ;;  %v791_v8 = vld [vmem:[#allocation4 + $0x44] ss:$8 sps:$4 sm:$0xff]   ;;  %v793_v9 = vld [vmem:[#allocation4 + $0x40] ss:$8 sps:$4 sm:$0xff]   ;;  %v794_v10 = vld [vmem:[#allocation4 + $0x54] ss:$8 sps:$4 sm:$0xff]  }
  0x4e   :  { %v796_v11 = vld [vmem:[#allocation4 + $0x50] ss:$8 sps:$4 sm:$0xff]   ;;  %v797_v12 = vld [vmem:[#allocation4 + $0x64] ss:$8 sps:$4 sm:$0xff]   ;;  %v799_v15 = vld [vmem:[#allocation4 + $0x60] ss:$8 sps:$4 sm:$0xff]  }
  0x4f   :  { %v83_v13 = vld [vmem:[#allocation2 + $0x8] sm:$0xff]  ;;  %v85_v14 = vld [vmem:[#allocation2 + $0x18] sm:$0xff]  ;;  %v827_v18 = vld [vmem:[#allocation6 + $0x40] sm:$0xff]   ;;  %v955_v54 = vmov 0.0   ;;  %v123_v56 = vshrl.u32 %v122_v55, 7  ;;  %vm956_vm0 = vmmov 0  }
  0x50   :  { %295 = vmatpush1.bf16.msra.mxu0 %v784_v3  ;;  %v800_v16 = vld [vmem:[#allocation4 + $0x74] ss:$8 sps:$4 sm:$0xff]   ;;  %v87_v17 = vpack.c.bf16 %v85_v14, %v83_v13  ;;  %v828_v19 = vld [vmem:[#allocation6] sm:$0xff]   ;;  %v802_v20 = vld [vmem:[#allocation4 + $0x70] ss:$8 sps:$4 sm:$0xff]   ;;  %716 = vmatprep.subr.bf16.mxu1 %v827_v18 }
  0x51   :  { %296 = vmatprep.subr.bf16.mxu0 %v785_v4  ;;  %v829_v21 = vld [vmem:[#allocation6 + $0x48] sm:$0xff]   ;;  %717 = vmatpush3.bf16.msra.mxu1 %v828_v19  ;;  %v831_v23 = vld [vmem:[#allocation6 + $0x50] sm:$0xff]   ;;  %v833_v27 = vld [vmem:[#allocation6 + $0x58] sm:$0xff]   ;;  %v124_v57 = vsub.s32 0, %v123_v56  ;;  %v128_v59 = vsub.s32 1, %v123_v56 }
  0x52   :  { %324 = vmatprep.mubr.bf16.mxu0 %v87_v17  ;;  %v830_v22 = vld [vmem:[#allocation6 + $0x8] sm:$0xff]   ;;  %718 = vmatprep.subr.bf16.mxu1 %v829_v21  ;;  %v832_v26 = vld [vmem:[#allocation6 + $0x10] sm:$0xff]   ;;  %v834_v30 = vld [vmem:[#allocation6 + $0x18] sm:$0xff]  }
  0x53   :  { %v803_v24 = vld [vmem:[#allocation4 + $0x84] ss:$8 sps:$4 sm:$0xff]   ;;  %v805_v25 = vld [vmem:[#allocation4 + $0x80] ss:$8 sps:$4 sm:$0xff]   ;;  %v806_v28 = vld [vmem:[#allocation4 + $0x94] ss:$8 sps:$4 sm:$0xff]  }
  0x54   :  { %297 = vmatpush1.bf16.msra.mxu0 %v787_v5  ;;  %v808_v29 = vld [vmem:[#allocation4 + $0x90] ss:$8 sps:$4 sm:$0xff]   ;;  %v835_v31 = vld [vmem:[#allocation6 + $0x60] sm:$0xff]   ;;  %v837_v35 = vld [vmem:[#allocation6 + $0x68] sm:$0xff]  }
  0x55   :  { %298 = vmatprep.subr.bf16.mxu0 %v788_v6  ;;  %719 = vmatpush3.bf16.msra.mxu1 %v830_v22  ;;  %v809_v32 = vld [vmem:[#allocation4 + $0xa4] ss:$8 sps:$4 sm:$0xff]   ;;  %v811_v34 = vld [vmem:[#allocation4 + $0xa0] ss:$8 sps:$4 sm:$0xff]   ;;  %v812_v36 = vld [vmem:[#allocation4 + $0xb4] ss:$8 sps:$4 sm:$0xff]  }
  0x56   :  { %720 = vmatprep.subr.bf16.mxu1 %v831_v23  ;;  %v836_v33 = vld [vmem:[#allocation6 + $0x20] sm:$0xff]   ;;  %v814_v37 = vld [vmem:[#allocation4 + $0xb0] ss:$8 sps:$4 sm:$0xff]   ;;  %v818_v40 = vld [vmem:[#allocation4 + $0xd4] ss:$8 sps:$4 sm:$0xff]  }
  0x57   :  { %v815_v38 = vld [vmem:[#allocation4 + $0xc4] ss:$8 sps:$4 sm:$0xff]   ;;  %v817_v39 = vld [vmem:[#allocation4 + $0xc0] ss:$8 sps:$4 sm:$0xff]   ;;  %v820_v41 = vld [vmem:[#allocation4 + $0xd0] ss:$8 sps:$4 sm:$0xff]  }
  0x58   :  { %299 = vmatpush1.bf16.msra.mxu0 %v790_v7  ;;  %v821_v42 = vld [vmem:[#allocation4 + $0xe4] ss:$8 sps:$4 sm:$0xff]   ;;  %v823_v43 = vld [vmem:[#allocation4 + $0xe0] ss:$8 sps:$4 sm:$0xff]   ;;  %v824_v44 = vld [vmem:[#allocation4 + $0xf4] ss:$8 sps:$4 sm:$0xff]  }
  0x59   :  { %300 = vmatprep.subr.bf16.mxu0 %v791_v8  ;;  %721 = vmatpush3.bf16.msra.mxu1 %v832_v26  ;;  %v826_v45 = vld [vmem:[#allocation4 + $0xf0] ss:$8 sps:$4 sm:$0xff]   ;;  %v82_v46 = vld [vmem:[#allocation2] sm:$0xff]  ;;  %v838_v49 = vld [vmem:[#allocation6 + $0x28] sm:$0xff]  }
  0x5a   :  { %722 = vmatprep.subr.bf16.mxu1 %v833_v27  ;;  %v84_v47 = vld [vmem:[#allocation2 + $0x10] sm:$0xff]  ;;  %v841_v52 = vld [vmem:[#allocation6 + $0x78] sm:$0xff]   ;;  %v120_v58 = vld [vmem:[%s1059_s2] sm:$0x3] }
  0x5b   :  { %v86_v48 = vpack.c.bf16 %v84_v47, %v82_v46  ;;  %v839_v50 = vld [vmem:[#allocation6 + $0x70] sm:$0xff]   ;;  %v842_v53 = vld [vmem:[#allocation6 + $0x38] sm:$0xff]   ;;  %v125_v60 = vrot.slane %v120_v58, %v124_v57  ;;  %v129_v61 = vrot.slane %v120_v58, %v128_v59  ;;  %v844_v13 = vld [vmem:[#allocation7 + $0x8] sm:$0xff]  }
  0x5c   :  { %301 = vmatpush1.bf16.msra.mxu0 %v793_v9  ;;  %v840_v51 = vld [vmem:[#allocation6 + $0x30] sm:$0xff]   ;;  %v848_v17 = vld [vmem:[#allocation7 + $0x28] sm:$0xff]   ;;  %v850_v19 = vld [vmem:[#allocation7 + $0x38] sm:$0xff]  }
  0x5d   :  { %302 = vmatprep.subr.bf16.mxu0 %v794_v10  ;;  %723 = vmatpush3.bf16.msra.mxu1 %v834_v30  ;;  %v845_v14 = vld [vmem:[#allocation7 + $0x10] sm:$0xff]   ;;  %v681_v21 = vld [vmem:[%s1061_s4] ss:$0 sm:$0xff] }
  0x5e   :  { %724 = vmatprep.subr.bf16.mxu1 %v835_v31  ;;  %v849_v18 = vld [vmem:[#allocation7 + $0x30] sm:$0xff]  }
  0x60   :  { %303 = vmatpush1.bf16.msra.mxu0 %v796_v11 }
  0x61   :  { %304 = vmatprep.subr.bf16.mxu0 %v797_v12  ;;  %725 = vmatpush3.bf16.msra.mxu1 %v836_v33  ;;  %v843_v12 = vld [vmem:[#allocation7] sm:$0xff]  }
  0x62   :  { %726 = vmatprep.subr.bf16.mxu1 %v837_v35 }
  0x64   :  { %305 = vmatpush1.bf16.msra.mxu0 %v799_v15  ;;  %v846_v15 = vld [vmem:[#allocation7 + $0x18] sm:$0xff]  }
  0x65   :  { %306 = vmatprep.subr.bf16.mxu0 %v800_v16  ;;  %727 = vmatpush3.bf16.msra.mxu1 %v838_v49  ;;  %v847_v16 = vld [vmem:[#allocation7 + $0x20] sm:$0xff]  }
  0x66   :  { %728 = vmatprep.subr.bf16.mxu1 %v839_v50 }
  0x68   :  { %307 = vmatpush1.bf16.msra.mxu0 %v802_v20 }
  0x69   :  { %308 = vmatprep.subr.bf16.mxu0 %v803_v24  ;;  %729 = vmatpush3.bf16.msra.mxu1 %v840_v51 }
  0x6a   :  { %730 = vmatprep.subr.bf16.mxu1 %v841_v52 }
  0x6c   :  { %309 = vmatpush1.bf16.msra.mxu0 %v805_v25 }
  0x6d   :  { %310 = vmatprep.subr.bf16.mxu0 %v806_v28  ;;  %731 = vmatpush3.bf16.msra.mxu1 %v842_v53 }
  0x6e   :  { %747 = vmatprep.subr.bf16.mxu1 %v955_v54 }
  0x70   :  { %311 = vmatpush1.bf16.msra.mxu0 %v808_v29 }
  0x71   :  { %312 = vmatprep.subr.bf16.mxu0 %v809_v32  ;;  %v698_v32 = vld [vmem:[%s1063_s6] ss:$0 sm:$0xff] }
  0x74   :  { %313 = vmatpush1.bf16.msra.mxu0 %v811_v34 }
  0x75   :  { %314 = vmatprep.subr.bf16.mxu0 %v812_v36 }
  0x78   :  { %315 = vmatpush1.bf16.msra.mxu0 %v814_v37 }
  0x79   :  { %316 = vmatprep.subr.bf16.mxu0 %v815_v38 }
  0x7c   :  { %317 = vmatpush1.bf16.msra.mxu0 %v817_v39 }
  0x7d   :  { %318 = vmatprep.subr.bf16.mxu0 %v818_v40 }
  0x80   :  { %319 = vmatpush1.bf16.msra.mxu0 %v820_v41 }
  0x81   :  { %320 = vmatprep.subr.bf16.mxu0 %v821_v42 }
  0x84   :  { %321 = vmatpush1.bf16.msra.mxu0 %v823_v43 }
  0x85   :  { %322 = vmatprep.subr.bf16.mxu0 %v824_v44 }
  0x88   :  { %323 = vmatpush1.bf16.msra.mxu0 %v826_v45 }
  0x8b   :  { %325 = vmatmul.mubr.bf16.vlgmr.msra.gmra.mrb[0].mxu0 %v86_v48 }
 0x15e   :  { %v326_v62 = vpop.f32.mrb[0].mxu0 }
 0x15f   :  { %v327_v63 = vadd.f32 %v326_v62, %v125_v60  ;;  %v328_v0 = vpop.f32.mrb[1].mxu0 }
 0x160   :  { %v329_v1 = vadd.f32 %v328_v0, %v129_v61  ;;  %v330_v2 = vpop.f32.mrb[2].mxu0 }
 0x161   :  { %v331_v3 = vadd.f32 %v330_v2, %v125_v60  ;;  %v332_v4 = vpop.f32.mrb[3].mxu0  ;;  %v335_v6 = vmax.f32 %v327_v63, 0.0 }
 0x162   :  { %v333_v5 = vadd.f32 %v332_v4, %v129_v61  ;;  %v336_v8 = vmax.f32 %v329_v1, 0.0 }
 0x163   :  { %v337_v7 = vmax.f32 %v331_v3, 0.0 }
 0x164   :  { %v338_v9 = vmax.f32 %v333_v5, 0.0 }
 0x165   :  { %v339_v10 = vpack.c.bf16 %v337_v7, %v335_v6 }
 0x166   :  { %v340_v11 = vpack.c.bf16 %v338_v9, %v336_v8 }
 0x168   :  { %508 = vmatprep.mubr.bf16.mxu1 %v340_v11 }
 0x169   :  { %509 = vmatmul.mubr.bf16.vlgmr.msra.gmra.mrb[0].mxu1 %v339_v10 }
 0x16a   :  { %748 = vmatpush3.bf16.msra.mxu1 %v843_v12  ;;  %763 = vmatprep.mubr.msk.bf16.mxu1 %vm956_vm0, %v955_v54 }
 0x16b   :  { %749 = vmatprep.subr.bf16.mxu1 %v955_v54 }
 0x16e   :  { %750 = vmatpush3.bf16.msra.mxu1 %v844_v13 }
 0x16f   :  { %751 = vmatprep.subr.bf16.mxu1 %v955_v54 }
 0x172   :  { %752 = vmatpush3.bf16.msra.mxu1 %v845_v14 }
 0x173   :  { %753 = vmatprep.subr.bf16.mxu1 %v955_v54 }
 0x176   :  { %754 = vmatpush3.bf16.msra.mxu1 %v846_v15 }
 0x177   :  { %755 = vmatprep.subr.bf16.mxu1 %v955_v54 }
 0x17a   :  { %756 = vmatpush3.bf16.msra.mxu1 %v847_v16 }
 0x17b   :  { %757 = vmatprep.subr.bf16.mxu1 %v955_v54 }
 0x17e   :  { %758 = vmatpush3.bf16.msra.mxu1 %v848_v17 }
 0x17f   :  { %759 = vmatprep.subr.bf16.mxu1 %v955_v54 }
 0x182   :  { %760 = vmatpush3.bf16.msra.mxu1 %v849_v18 }
 0x183   :  { %761 = vmatprep.subr.bf16.mxu1 %v955_v54 }
 0x186   :  { %762 = vmatpush3.bf16.msra.mxu1 %v850_v19 }
 0x23c   :  { %v732_v20 = vpop.f32.mrb[0].mxu1 }
 0x23d   :  { %v733_v22 = vpop.f32.mrb[1].mxu1 }
 0x23e   :  { %v734_v23 = vadd.f32 %v733_v22, %v732_v20  ;;  %v735_v24 = vpop.f32.mrb[2].mxu1 }
 0x23f   :  { %v736_v25 = vpop.f32.mrb[3].mxu1 }
 0x240   :  { %v511_v26 = vadd.f32 %v734_v23, %v681_v21  ;;  %v737_v27 = vadd.f32 %v736_v25, %v735_v24 }
 0x242   :  { %v514_v28 = vadd.f32 %v737_v27, %v681_v21  ;;  %v517_v29 = vmax.f32 %v511_v26, 0.0 }
 0x244   :  { %v518_v30 = vmax.f32 %v514_v28, 0.0 }
 0x246   :  { %v519_v31 = vpack.c.bf16 %v518_v30, %v517_v29 }
 0x248   :  { %764 = vmatmul.mubr.bf16.vlgmr.msra.gmra.mrb[4].mxu1 %v519_v31 }
 0x31b   :  { %v625_v33 = vpop.f32.mrb[4].mxu1 }
 0x31c   :  { %v765_v34 = vpop.f32.mrb[5].mxu1  ;;  %v626_v36 = vadd.f32 %v698_v32, %v625_v33 }
 0x31d   :  { %v628_v35 = vpop.f32.mrb[6].mxu1 }
 0x31e   :  { %v629_v37 = vadd.f32 %v698_v32, %v628_v35  ;;  %v766_v38 = vpop.f32.mrb[7].mxu1 }
 0x320   :  { %v714_v39 = vpack.c.bf16 %v629_v37, %v626_v36 }
 0x322   :  { %715 = vst [vmem:[%s1064_s7] sm:$0xff] %v714_v39  }
 0x323   :  { %646 = vsyncpa [#allocation3], 1 }
 0x324   :  { %647 = vsyncpa [#allocation5], 1 }
 0x325   :  { %648 = vsyncpa [#allocation8], 1 }

</bundles_post_ra>
